<compile_context>
chip_gen: v7x
topology: tpu7x:2x2x1
jax: 0.10.0
libtpu: 0.0.40
codegen_flags: <defaults>
</compile_context>

<pallas_src>
import jax
import jax.numpy as jnp
import numpy as np
from jax.experimental import pallas as pl
from jax.experimental.pallas import tpu as pltpu


# ----------------------------- small helpers ----------------------------------

def _leaky(x):
    return jnp.where(x > 0, x, 0.1 * x)        # LeakyReLU(0.1) as in the PyTorch module


def _shift_mats(size, k):
    """S[t][i, j] = 1 iff j == i + t - k//2 (zero-padded 'same' cross-correlation)."""
    i = jnp.arange(size)[:, None]
    j = jnp.arange(size)[None, :]
    return jnp.stack([(j == i + (t - k // 2)).astype(jnp.float32) for t in range(k)], 0)


def _pick_b_tile(B, C, N):
    """Largest batch tile giving ~128 lanes (C*Bt*N) that divides B."""
    t = max(1, min(B, 128 // max(1, C * N)))
    while B % t:
        t -= 1
    return t


# ------------------------------ fused kernel -----------------------------------

def _make_kernel(C, Bt, L, N):
    lanes = C * Bt * N

    def kernel(x_ref,                 # (L, lanes)   f32 activation slab (one batch tile)
               ma_ref,                # (6L, L)      [3-tap shift o rfft_L]
               w3r_ref, w3i_ref,      # (3, lanes)   per-lane depthwise 3-tap weights
               b1r_ref, b1i_ref,      # (1, lanes)
               w7slab_ref,            # (14L, lanes) per-lane 7-tap weights, row-block slab
               mb_ref,                # (3L, 14L)    [fs L-shift o irfft_L o 7-tap shift]
               wmix_ref,              # (3*lanes, lanes)  W_fs (x) I_BN  (fs channel mix)
               tail_ref,              # (L, lanes)   folded FTIM biases
               g1_ref,                # (lanes, K1)  FVIM: rfft_N o 1x1 mix (K1 = lanes)
               bias1_ref,             # (1, K1)
               g2_ref,                # (K1, lanes)  FVIM: (1,3) mix-conv o irfft_N o 1x1
               bias2_ref,             # (1, lanes)
               o_ref):                # (L, lanes)
        x = x_ref[...]

        # ------------------------------ FTIM ------------------------------
        # Stage 1: Re/Im(rfft_L(x)) at all 3 shifted tap positions in ONE matmul,
        # then per-lane (= per-channel) depthwise tap weights + bias on the VPU.
        y = jnp.dot(ma_ref[...], x, preferred_element_type=jnp.float32)     # (6L, lanes)
        yr = b1r_ref[...]
        yi = b1i_ref[...]
        for t in range(3):
            yr = yr + w3r_ref[t:t + 1, :] * y[t * L:(t + 1) * L, :]
            yi = yi + w3i_ref[t:t + 1, :] * y[(3 + t) * L:(4 + t) * L, :]
        zr = _leaky(yr)
        zi = _leaky(yi)

        # Stage 2: per-lane 7-tap weights via ONE precomputed slab multiply; the
        # 7-tap shifts, irfft_L and the fs (3,1) L-shifts are all folded into mb.
        zstack = jnp.concatenate([zr] * 7 + [zi] * 7, axis=0) * w7slab_ref[...]   # (14L, lanes)
        xs3 = jnp.dot(mb_ref[...], zstack, preferred_element_type=jnp.float32)    # (3L, lanes)

        # frequency_spatial (C x C, 3-tap): ONE lane-contracting MXU matmul.
        xcat = jnp.concatenate([xs3[0:L, :], xs3[L:2 * L, :], xs3[2 * L:3 * L, :]],
                               axis=1)                                             # (L, 3*lanes)
        mix = jnp.dot(xcat, wmix_ref[...], preferred_element_type=jnp.float32)     # (L, lanes)
        out1 = mix + tail_ref[...] + x                                             # FTIM residual

        # ------------------------------ FVIM ------------------------------
        # rfft_N, the 1x1 mix, the (1,3) mix-conv, irfft_N and the final 1x1 all act
        # on the lane axis -> exactly two lane-contracting matmuls around the ReLU.
        u = jnp.dot(out1, g1_ref[...], preferred_element_type=jnp.float32) + bias1_ref[...]
        v = _leaky(u)
        y2 = jnp.dot(v, g2_ref[...], preferred_element_type=jnp.float32) + bias2_ref[...]
        o_ref[...] = y2 + out1                                                     # FVIM residual

    return kernel


# ---------------------- precomputed (hoisted) constants -------------------------

def build_constants(p, Bt, C, L, N):
    """Built ONCE per batch-tile size: folded DFT/conv operators for the kernel."""
    f32 = jnp.float32
    FL, FN = L // 2 + 1, N // 2 + 1
    BN = Bt * N
    lanes = C * BN

    # ---------------- FTIM (transform axis L, on sublanes) ----------------
    WL = jnp.fft.rfft(jnp.eye(L, dtype=f32), norm='ortho')                    # (L, FL)
    WLr, WLi = jnp.real(WL).astype(f32), jnp.imag(WL).astype(f32)
    WiLr = jnp.fft.irfft(jnp.eye(FL, dtype=jnp.complex64), n=L, norm='ortho').astype(f32)
    WiLi = jnp.fft.irfft(1j * jnp.eye(FL, dtype=jnp.complex64), n=L, norm='ortho').astype(f32)
    A3, A7, SL = _shift_mats(FL, 3), _shift_mats(FL, 7), _shift_mats(L, 3)

    pad_r = lambda m: jnp.pad(m, ((0, L - FL), (0, 0)))     # (FL, L) -> (L, L)
    pad_c = lambda m: jnp.pad(m, ((0, 0), (0, L - FL)))     # (L, FL) -> (L, L)

    ma = jnp.concatenate([pad_r(A3[t] @ WLr.T) for t in range(3)] +
                         [pad_r(A3[t] @ WLi.T) for t in range(3)], axis=0)    # (6L, L)

    row = jnp.concatenate([pad_c(WiLr.T @ A7[t]) for t in range(7)] +
                          [pad_c(WiLi.T @ A7[t]) for t in range(7)], axis=1)  # (L, 14L)
    mb = jnp.concatenate([SL[s] @ row for s in range(3)], axis=0)             # (3L, 14L)

    # Per-lane depthwise weights / biases; lane order = (c, b, n), c-major.
    rep_w = lambda w: jnp.repeat(w.T, BN, axis=1)           # (C, k) -> (k, lanes)
    rep_b = lambda b: jnp.repeat(b, BN)[None, :]            # (C,)   -> (1, lanes)
    w3r, w3i = rep_w(p['spa_rw1']), rep_w(p['spa_iw1'])
    b1r, b1i = rep_b(p['spa_rb1']), rep_b(p['spa_ib1'])
    w7r, w7i = rep_w(p['spa_rw2']), rep_w(p['spa_iw2'])
    # One (14L, lanes) slab: block t has w7r[t] (t<7) / w7i[t-7] repeated on its L rows.
    w7slab = jnp.repeat(jnp.concatenate([w7r, w7i], axis=0), L, axis=0)       # (14L, lanes)

    # frequency_spatial channel mix as a (3*lanes, lanes) block matrix: W_fs (x) I_BN.
    wfs = p['ftim_fs_w']                                                      # (C, C, 3)
    eyeBN = jnp.eye(BN, dtype=f32)
    wmix = jnp.einsum('cds,jk->sdjck', wfs, eyeBN).reshape(3 * lanes, lanes)

    # FTIM tail bias: fs conv applied to the constant 7-tap biases after irfft,
    # plus the fs bias itself.
    ur, ui = jnp.sum(WiLr, axis=0), jnp.sum(WiLi, axis=0)                     # (L,)
    urs = jnp.einsum('slk,k->sl', SL, ur)
    uis = jnp.einsum('slk,k->sl', SL, ui)
    tail_cl = (p['ftim_fs_b'][:, None]
               + jnp.einsum('cds,d,sl->cl', wfs, p['spa_rb2'], urs)
               + jnp.einsum('cds,d,sl->cl', wfs, p['spa_ib2'], uis))          # (C, L)
    tail = jnp.broadcast_to(tail_cl.T[:, :, None, None], (L, C, Bt, N)).reshape(L, lanes)

    # ---------------- FVIM (transform axis N, on lanes) -------------------
    WN = jnp.fft.rfft(jnp.eye(N, dtype=f32), norm='ortho')                    # (N, FN)
    FNr, FNi = jnp.real(WN).astype(f32), jnp.imag(WN).astype(f32)
    WiNr = jnp.fft.irfft(jnp.eye(FN, dtype=jnp.complex64), n=N, norm='ortho').astype(f32)
    WiNi = jnp.fft.irfft(1j * jnp.eye(FN, dtype=jnp.complex64), n=N, norm='ortho').astype(f32)
    A3N = _shift_mats(FN, 3)
    eyeB = jnp.eye(Bt, dtype=f32)

    def g1_half(w1, fm):                 # rfft_N fused with the 1x1 channel mix
        t = jnp.einsum('oc,nf,bd->cbnodf', w1, fm, eyeB)    # (Cin,Bt,N, Cout,Bt,FN)
        return t.reshape(C * Bt * N, C * Bt * FN)

    g1 = jnp.concatenate([g1_half(p['cha_rw1'], FNr),
                          g1_half(p['cha_iw1'], FNi)], axis=1)                # (lanes, 2*C*Bt*FN)
    bias1 = jnp.concatenate([jnp.repeat(p['cha_rb1'], Bt * FN),
                             jnp.repeat(p['cha_ib1'], Bt * FN)])[None, :]

    def g2_half(w2, wi):                 # (1,3) mix-conv o irfft_N o final 1x1, fused
        m = jnp.einsum('ck,kdt->tcd', p['fvim_fs_w'], w2)   # (3, Cout, Cin)
        ct = jnp.einsum('tfg,fn->tgn', A3N, wi)             # (3, FN, N)
        core = jnp.einsum('tcd,tfn->dfcn', m, ct)           # (Cin, FN, Cout, N)
        full = jnp.einsum('dfcn,be->dbfcen', core, eyeB)    # (Cin,Bt,FN, Cout,Bt,N)
        return full.reshape(C * Bt * FN, C * Bt * N)

    g2 = jnp.concatenate([g2_half(p['cha_rw2'], WiNr),
                          g2_half(p['cha_iw2'], WiNi)], axis=0)               # (2*C*Bt*FN, lanes)

    sr, si = jnp.sum(WiNr, axis=0), jnp.sum(WiNi, axis=0)
    tmp = (p['fvim_fs_b'][:, None]
           + p['fvim_fs_w'] @ (jnp.outer(p['cha_rb2'], sr) + jnp.outer(p['cha_ib2'], si)))
    bias2 = jnp.broadcast_to(tmp[:, None, :], (C, Bt, N)).reshape(1, lanes)

    # ---- K1 trim 144 -> 128: imag-half DC/Nyquist columns of g1 are identically
    # zero (Im of DFT at f=0 and f=N/2 vanishes); fold leaky(bias1) there into bias2.
    K_full = 2 * C * Bt * FN
    idx = np.arange(K_full)
    f_of = idx % FN
    is_imag = idx >= C * Bt * FN
    drop = is_imag & ((f_of == 0) | ((f_of == FN - 1) & (N % 2 == 0)))
    drop_idx = np.nonzero(drop)[0]
    keep_idx = np.nonzero(~drop)[0]
    if drop_idx.size:
        v_drop = _leaky(bias1[0, drop_idx])                  # those columns are constant
        bias2 = bias2 + v_drop[None, :] @ g2[drop_idx, :]
    g1 = g1[:, keep_idx]
    bias1 = bias1[:, keep_idx]
    g2 = g2[keep_idx, :]

    return dict(ma=ma, w3r=w3r, w3i=w3i, b1r=b1r, b1i=b1i,
                w7slab=w7slab, mb=mb, wmix=wmix, tail=tail,
                g1=g1, bias1=bias1, g2=g2, bias2=bias2)


# --------------------------------- wrapper --------------------------------------

def process_block_pallas(x, consts):
    """x: (B, C, L, N) float32 -> (B, C, L, N) float32."""
    B, C, L, N = x.shape
    lanes = consts['tail'].shape[1]
    Bt = lanes // (C * N)
    assert B % Bt == 0, "batch must be a multiple of the lane-tile batch size"
    n_tiles = B // Bt

    # Lane-dense slab per tile: sublanes = L, lanes = (c, b, n), c-major.
    # TODO(synk): at scale, make (tiles, L, C*Bt*N) the canonical inter-layer layout so
    # stacked ProcessBlocks chain in VMEM without these wrapper transposes.
    xt = (x.reshape(n_tiles, Bt, C, L, N)
           .transpose(0, 3, 2, 1, 4)
           .reshape(n_tiles, L, lanes)
           .astype(jnp.float32))

    ordered = (consts['ma'], consts['w3r'], consts['w3i'], consts['b1r'], consts['b1i'],
               consts['w7slab'], consts['mb'], consts['wmix'], consts['tail'],
               consts['g1'], consts['bias1'], consts['g2'], consts['bias2'])

    def _const_spec(a):
        nd = a.ndim
        return pl.BlockSpec(a.shape, lambda t, _nd=nd: (0,) * _nd)

    kernel = _make_kernel(C, Bt, L, N)
    out = pl.pallas_call(
        kernel,
        out_shape=jax.ShapeDtypeStruct((n_tiles, L, lanes), jnp.float32),
        grid_spec=pltpu.PrefetchScalarGridSpec(
            num_scalar_prefetch=0,
            grid=(n_tiles,),                      # one 128-lane batch tile per step
            in_specs=[pl.BlockSpec((None, L, lanes), lambda t: (t, 0, 0))]
                     + [_const_spec(a) for a in ordered],
            out_specs=pl.BlockSpec((None, L, lanes), lambda t: (t, 0, 0)),
        ),
        compiler_params=pltpu.CompilerParams(
            dimension_semantics=("parallel",),    # tile axis shards across TCs on v7x
        ),
    )(xt, *ordered)

    return (out.reshape(n_tiles, L, C, Bt, N)
               .transpose(0, 3, 2, 1, 4)
               .reshape(B, C, L, N))


# --------------------------- pure-JAX reference ----------------------------------

def _conv2d_ref(x, w, b, pad, groups=1):
    out = jax.lax.conv_general_dilated(
        x, w, window_strides=(1, 1),
        padding=((pad[0], pad[0]), (pad[1], pad[1])),
        dimension_numbers=('NCHW', 'OIHW', 'NCHW'),
        feature_group_count=groups,
        precision=jax.lax.Precision.HIGHEST)
    return out + b[None, :, None, None]


def process_block_ref(x, p):
    B, C, L, N = x.shape
    # FTIM
    xf = jnp.fft.rfft(x, axis=2, norm='ortho')

    def spa(v, w1, b1, w2, b2):
        v = _conv2d_ref(v, w1.reshape(C, 1, -1, 1), b1, (1, 0), groups=C)
        v = _leaky(v)
        v = _conv2d_ref(v, w2.reshape(C, 1, -1, 1), b2, (3, 0), groups=C)
        return v

    re = spa(jnp.real(xf), p['spa_rw1'], p['spa_rb1'], p['spa_rw2'], p['spa_rb2'])
    im = spa(jnp.imag(xf), p['spa_iw1'], p['spa_ib1'], p['spa_iw2'], p['spa_ib2'])
    xs = jnp.fft.irfft(re + 1j * im, n=L, axis=2, norm='ortho')
    xs = _conv2d_ref(xs, p['ftim_fs_w'][:, :, :, None], p['ftim_fs_b'], (1, 0))
    x = xs + x

    # FVIM
    xf = jnp.fft.rfft(x, axis=3, norm='ortho')

    def cha(v, w1, b1, w2, b2):
        v = _conv2d_ref(v, w1[:, :, None, None], b1, (0, 0))
        v = _leaky(v)
        v = _conv2d_ref(v, w2[:, :, None, :], b2, (0, 1))
        return v

    re = cha(jnp.real(xf), p['cha_rw1'], p['cha_rb1'], p['cha_rw2'], p['cha_rb2'])
    im = cha(jnp.imag(xf), p['cha_iw1'], p['cha_ib1'], p['cha_iw2'], p['cha_ib2'])
    xs = jnp.fft.irfft(re + 1j * im, n=N, axis=3, norm='ortho')
    xs = _conv2d_ref(xs, p['fvim_fs_w'][:, :, None, None], p['fvim_fs_b'], (0, 0))
    return xs + x


# ------------------------------- parameters --------------------------------------

def init_params(key, nc):
    ks = jax.random.split(key, 20)

    def w(k, shape, scale=0.2):
        return (scale * jax.random.normal(k, shape)).astype(jnp.float32)

    return {
        # FTIM / FreBlockSpa (depthwise convs, groups=nc)
        'spa_rw1': w(ks[0], (nc, 3)), 'spa_rb1': w(ks[1], (nc,)),
        'spa_rw2': w(ks[2], (nc, 7)), 'spa_rb2': w(ks[3], (nc,)),
        'spa_iw1': w(ks[4], (nc, 3)), 'spa_ib1': w(ks[5], (nc,)),
        'spa_iw2': w(ks[6], (nc, 7)), 'spa_ib2': w(ks[7], (nc,)),
        # FTIM frequency_spatial Conv2d(nc, nc, (3,1))
        'ftim_fs_w': w(ks[8], (nc, nc, 3)), 'ftim_fs_b': w(ks[9], (nc,)),
        # FVIM / FreBlockCha (1x1 and (1,3) convs)
        'cha_rw1': w(ks[10], (nc, nc)), 'cha_rb1': w(ks[11], (nc,)),
        'cha_rw2': w(ks[12], (nc, nc, 3)), 'cha_rb2': w(ks[13], (nc,)),
        'cha_iw1': w(ks[14], (nc, nc)), 'cha_ib1': w(ks[15], (nc,)),
        'cha_iw2': w(ks[16], (nc, nc, 3)), 'cha_ib2': w(ks[17], (nc,)),
        # FVIM frequency_spatial Conv2d(nc, nc, 1)
        'fvim_fs_w': w(ks[18], (nc, nc)), 'fvim_fs_b': w(ks[19], (nc,)),
        # NOTE: FTIM.cat / FVIM.cat convs exist in __init__ but are unused in forward.
    }


# ----------------------------------- main -----------------------------------------

if __name__ == "__main__":
    key = jax.random.PRNGKey(0)
    kx, kp = jax.random.split(key)
    B, C, L, N = 2, 4, 16, 16
    x = jax.random.normal(kx, (B, C, L, N), dtype=jnp.float32)
    params = init_params(kp, C)

    # Precompute the folded operators ONCE (hoisted out of the per-call path).
    Bt = _pick_b_tile(B, C, N)                 # 2 -> lanes = C*Bt*N = 128
    consts = build_constants(params, Bt, C, L, N)

    apply_fn = jax.jit(process_block_pallas)
    out = jax.block_until_ready(apply_fn(x, consts))

    ref = jax.block_until_ready(process_block_ref(x, params))
    assert out.shape == (B, C, L, N)
    max_err = float(jnp.max(jnp.abs(out - ref)))
    assert max_err < 5e-2, f"max abs err too large: {max_err}"

    print("KERNEL_OK")
</pallas_src>

<mosaic_0001>
module attributes {stable_mosaic.version = 11 : i64} {
  func.func @kernel(%arg0: i32, %arg1: memref<1x16x128xf32, #tpu.memory_space<vmem>>, %arg2: memref<96x16xf32, #tpu.memory_space<vmem>>, %arg3: memref<3x128xf32, #tpu.memory_space<vmem>>, %arg4: memref<3x128xf32, #tpu.memory_space<vmem>>, %arg5: memref<1x128xf32, #tpu.memory_space<vmem>>, %arg6: memref<1x128xf32, #tpu.memory_space<vmem>>, %arg7: memref<224x128xf32, #tpu.memory_space<vmem>>, %arg8: memref<48x224xf32, #tpu.memory_space<vmem>>, %arg9: memref<384x128xf32, #tpu.memory_space<vmem>>, %arg10: memref<16x128xf32, #tpu.memory_space<vmem>>, %arg11: memref<128x128xf32, #tpu.memory_space<vmem>>, %arg12: memref<1x128xf32, #tpu.memory_space<vmem>>, %arg13: memref<128x128xf32, #tpu.memory_space<vmem>>, %arg14: memref<1x128xf32, #tpu.memory_space<vmem>>, %arg15: memref<1x16x128xf32, #tpu.memory_space<vmem>>) attributes {dimension_semantics = [#tpu.dimension_semantics<parallel>], iteration_bounds = array<i64: 1>, scalar_prefetch = 0 : i64, scratch_operands = 0 : i64, tpu.core_type = #tpu.core_type<tc>, window_params = [{transform_indices = @transform_0, window_bounds = array<i64: 1, 16, 128>}, {pipeline_mode = #tpu.pipeline_mode<synchronous>, transform_indices = @transform_1, window_bounds = array<i64: 96, 16>}, {pipeline_mode = #tpu.pipeline_mode<synchronous>, transform_indices = @transform_2, window_bounds = array<i64: 3, 128>}, {pipeline_mode = #tpu.pipeline_mode<synchronous>, transform_indices = @transform_3, window_bounds = array<i64: 3, 128>}, {pipeline_mode = #tpu.pipeline_mode<synchronous>, transform_indices = @transform_4, window_bounds = array<i64: 1, 128>}, {pipeline_mode = #tpu.pipeline_mode<synchronous>, transform_indices = @transform_5, window_bounds = array<i64: 1, 128>}, {pipeline_mode = #tpu.pipeline_mode<synchronous>, transform_indices = @transform_6, window_bounds = array<i64: 224, 128>}, {pipeline_mode = #tpu.pipeline_mode<synchronous>, transform_indices = @transform_7, window_bounds = array<i64: 48, 224>}, {pipeline_mode = #tpu.pipeline_mode<synchronous>, transform_indices = @transform_8, window_bounds = array<i64: 384, 128>}, {pipeline_mode = #tpu.pipeline_mode<synchronous>, transform_indices = @transform_9, window_bounds = array<i64: 16, 128>}, {pipeline_mode = #tpu.pipeline_mode<synchronous>, transform_indices = @transform_10, window_bounds = array<i64: 128, 128>}, {pipeline_mode = #tpu.pipeline_mode<synchronous>, transform_indices = @transform_11, window_bounds = array<i64: 1, 128>}, {pipeline_mode = #tpu.pipeline_mode<synchronous>, transform_indices = @transform_12, window_bounds = array<i64: 128, 128>}, {pipeline_mode = #tpu.pipeline_mode<synchronous>, transform_indices = @transform_13, window_bounds = array<i64: 1, 128>}, {transform_indices = @transform_14, window_bounds = array<i64: 1, 16, 128>}]} {
    %c0 = arith.constant 0 : index
    %c0_0 = arith.constant 0 : index
    %c0_1 = arith.constant 0 : index
    %0 = vector.load %arg1[%c0, %c0_0, %c0_1] : memref<1x16x128xf32, #tpu.memory_space<vmem>>, vector<1x16x128xf32>
    %1 = vector.shape_cast %0 : vector<1x16x128xf32> to vector<16x128xf32>
    %c0_2 = arith.constant 0 : index
    %c0_3 = arith.constant 0 : index
    %2 = vector.load %arg2[%c0_2, %c0_3] : memref<96x16xf32, #tpu.memory_space<vmem>>, vector<96x16xf32>
    %cst = arith.constant dense<0.000000e+00> : vector<96x128xf32>
    %3 = tpu.matmul %2, %1, %cst {dimension_numbers = #tpu.dot_dimension_numbers<[1], [0], [0], [1], [0, 0, 1, 1], [], []>} : vector<96x16xf32>, vector<16x128xf32>, vector<96x128xf32> -> vector<96x128xf32>
    %c0_4 = arith.constant 0 : index
    %c0_5 = arith.constant 0 : index
    %4 = vector.load %arg5[%c0_4, %c0_5] : memref<1x128xf32, #tpu.memory_space<vmem>>, vector<1x128xf32>
    %c0_6 = arith.constant 0 : index
    %c0_7 = arith.constant 0 : index
    %5 = vector.load %arg6[%c0_6, %c0_7] : memref<1x128xf32, #tpu.memory_space<vmem>>, vector<1x128xf32>
    %c0_8 = arith.constant 0 : index
    %c0_9 = arith.constant 0 : index
    %6 = vector.load %arg3[%c0_8, %c0_9] : memref<3x128xf32, #tpu.memory_space<vmem>>, vector<1x128xf32>
    %7 = vector.extract_strided_slice %3 {offsets = [0, 0], sizes = [16, 128], strides = [1, 1]} : vector<96x128xf32> to vector<16x128xf32>
    %8 = vector.broadcast %6 : vector<1x128xf32> to vector<16x128xf32>
    %9 = arith.mulf %8, %7 : vector<16x128xf32>
    %10 = vector.broadcast %4 : vector<1x128xf32> to vector<16x128xf32>
    %11 = arith.addf %10, %9 : vector<16x128xf32>
    %c0_10 = arith.constant 0 : index
    %c0_11 = arith.constant 0 : index
    %12 = vector.load %arg4[%c0_10, %c0_11] : memref<3x128xf32, #tpu.memory_space<vmem>>, vector<1x128xf32>
    %13 = vector.extract_strided_slice %3 {offsets = [48, 0], sizes = [16, 128], strides = [1, 1]} : vector<96x128xf32> to vector<16x128xf32>
    %14 = vector.broadcast %12 : vector<1x128xf32> to vector<16x128xf32>
    %15 = arith.mulf %14, %13 : vector<16x128xf32>
    %16 = vector.broadcast %5 : vector<1x128xf32> to vector<16x128xf32>
    %17 = arith.addf %16, %15 : vector<16x128xf32>
    %c1 = arith.constant 1 : index
    %c0_12 = arith.constant 0 : index
    %18 = vector.load %arg3[%c1, %c0_12] : memref<3x128xf32, #tpu.memory_space<vmem>>, vector<1x128xf32>
    %19 = vector.extract_strided_slice %3 {offsets = [16, 0], sizes = [16, 128], strides = [1, 1]} : vector<96x128xf32> to vector<16x128xf32>
    %20 = vector.broadcast %18 : vector<1x128xf32> to vector<16x128xf32>
    %21 = arith.mulf %20, %19 : vector<16x128xf32>
    %22 = arith.addf %11, %21 : vector<16x128xf32>
    %c1_13 = arith.constant 1 : index
    %c0_14 = arith.constant 0 : index
    %23 = vector.load %arg4[%c1_13, %c0_14] : memref<3x128xf32, #tpu.memory_space<vmem>>, vector<1x128xf32>
    %24 = vector.extract_strided_slice %3 {offsets = [64, 0], sizes = [16, 128], strides = [1, 1]} : vector<96x128xf32> to vector<16x128xf32>
    %25 = vector.broadcast %23 : vector<1x128xf32> to vector<16x128xf32>
    %26 = arith.mulf %25, %24 : vector<16x128xf32>
    %27 = arith.addf %17, %26 : vector<16x128xf32>
    %c2 = arith.constant 2 : index
    %c0_15 = arith.constant 0 : index
    %28 = vector.load %arg3[%c2, %c0_15] : memref<3x128xf32, #tpu.memory_space<vmem>>, vector<1x128xf32>
    %29 = vector.extract_strided_slice %3 {offsets = [32, 0], sizes = [16, 128], strides = [1, 1]} : vector<96x128xf32> to vector<16x128xf32>
    %30 = vector.broadcast %28 : vector<1x128xf32> to vector<16x128xf32>
    %31 = arith.mulf %30, %29 : vector<16x128xf32>
    %32 = arith.addf %22, %31 : vector<16x128xf32>
    %c2_16 = arith.constant 2 : index
    %c0_17 = arith.constant 0 : index
    %33 = vector.load %arg4[%c2_16, %c0_17] : memref<3x128xf32, #tpu.memory_space<vmem>>, vector<1x128xf32>
    %34 = vector.extract_strided_slice %3 {offsets = [80, 0], sizes = [16, 128], strides = [1, 1]} : vector<96x128xf32> to vector<16x128xf32>
    %35 = vector.broadcast %33 : vector<1x128xf32> to vector<16x128xf32>
    %36 = arith.mulf %35, %34 : vector<16x128xf32>
    %37 = arith.addf %27, %36 : vector<16x128xf32>
    %cst_18 = arith.constant 0.000000e+00 : f32
    %38 = vector.broadcast %cst_18 : f32 to vector<16x128xf32>
    %39 = arith.cmpf ogt, %32, %38 : vector<16x128xf32>
    %cst_19 = arith.constant 1.000000e-01 : f32
    %40 = vector.broadcast %cst_19 : f32 to vector<16x128xf32>
    %41 = arith.mulf %40, %32 : vector<16x128xf32>
    %42 = arith.select %39, %32, %41 : vector<16x128xi1>, vector<16x128xf32>
    %cst_20 = arith.constant 0.000000e+00 : f32
    %43 = vector.broadcast %cst_20 : f32 to vector<16x128xf32>
    %44 = arith.cmpf ogt, %37, %43 : vector<16x128xf32>
    %cst_21 = arith.constant 1.000000e-01 : f32
    %45 = vector.broadcast %cst_21 : f32 to vector<16x128xf32>
    %46 = arith.mulf %45, %37 : vector<16x128xf32>
    %47 = arith.select %44, %37, %46 : vector<16x128xi1>, vector<16x128xf32>
    %48 = tpu.concatenate %42, %42, %42, %42, %42, %42, %42, %47, %47, %47, %47, %47, %47, %47 in 0 : vector<16x128xf32>, vector<16x128xf32>, vector<16x128xf32>, vector<16x128xf32>, vector<16x128xf32>, vector<16x128xf32>, vector<16x128xf32>, vector<16x128xf32>, vector<16x128xf32>, vector<16x128xf32>, vector<16x128xf32>, vector<16x128xf32>, vector<16x128xf32>, vector<16x128xf32> -> vector<224x128xf32>
    %c0_22 = arith.constant 0 : index
    %c0_23 = arith.constant 0 : index
    %49 = vector.load %arg7[%c0_22, %c0_23] : memref<224x128xf32, #tpu.memory_space<vmem>>, vector<224x128xf32>
    %50 = arith.mulf %48, %49 : vector<224x128xf32>
    %c0_24 = arith.constant 0 : index
    %c0_25 = arith.constant 0 : index
    %51 = vector.load %arg8[%c0_24, %c0_25] : memref<48x224xf32, #tpu.memory_space<vmem>>, vector<48x224xf32>
    %cst_26 = arith.constant dense<0.000000e+00> : vector<48x128xf32>
    %52 = tpu.matmul %51, %50, %cst_26 {dimension_numbers = #tpu.dot_dimension_numbers<[1], [0], [0], [1], [0, 0, 1, 1], [], []>} : vector<48x224xf32>, vector<224x128xf32>, vector<48x128xf32> -> vector<48x128xf32>
    %53 = vector.extract_strided_slice %52 {offsets = [0, 0], sizes = [16, 128], strides = [1, 1]} : vector<48x128xf32> to vector<16x128xf32>
    %54 = vector.extract_strided_slice %52 {offsets = [16, 0], sizes = [16, 128], strides = [1, 1]} : vector<48x128xf32> to vector<16x128xf32>
    %55 = vector.extract_strided_slice %52 {offsets = [32, 0], sizes = [16, 128], strides = [1, 1]} : vector<48x128xf32> to vector<16x128xf32>
    %56 = tpu.concatenate %53, %54, %55 in 1 : vector<16x128xf32>, vector<16x128xf32>, vector<16x128xf32> -> vector<16x384xf32>
    %c0_27 = arith.constant 0 : index
    %c0_28 = arith.constant 0 : index
    %57 = vector.load %arg9[%c0_27, %c0_28] : memref<384x128xf32, #tpu.memory_space<vmem>>, vector<384x128xf32>
    %cst_29 = arith.constant dense<0.000000e+00> : vector<16x128xf32>
    %58 = tpu.matmul %56, %57, %cst_29 {dimension_numbers = #tpu.dot_dimension_numbers<[1], [0], [0], [1], [0, 0, 1, 1], [], []>} : vector<16x384xf32>, vector<384x128xf32>, vector<16x128xf32> -> vector<16x128xf32>
    %c0_30 = arith.constant 0 : index
    %c0_31 = arith.constant 0 : index
    %59 = vector.load %arg10[%c0_30, %c0_31] : memref<16x128xf32, #tpu.memory_space<vmem>>, vector<16x128xf32>
    %60 = arith.addf %58, %59 : vector<16x128xf32>
    %61 = arith.addf %60, %1 : vector<16x128xf32>
    %c0_32 = arith.constant 0 : index
    %c0_33 = arith.constant 0 : index
    %62 = vector.load %arg11[%c0_32, %c0_33] : memref<128x128xf32, #tpu.memory_space<vmem>>, vector<128x128xf32>
    %cst_34 = arith.constant dense<0.000000e+00> : vector<16x128xf32>
    %63 = tpu.matmul %61, %62, %cst_34 {dimension_numbers = #tpu.dot_dimension_numbers<[1], [0], [0], [1], [0, 0, 1, 1], [], []>} : vector<16x128xf32>, vector<128x128xf32>, vector<16x128xf32> -> vector<16x128xf32>
    %c0_35 = arith.constant 0 : index
    %c0_36 = arith.constant 0 : index
    %64 = vector.load %arg12[%c0_35, %c0_36] : memref<1x128xf32, #tpu.memory_space<vmem>>, vector<1x128xf32>
    %65 = vector.broadcast %64 : vector<1x128xf32> to vector<16x128xf32>
    %66 = arith.addf %63, %65 : vector<16x128xf32>
    %cst_37 = arith.constant 0.000000e+00 : f32
    %67 = vector.broadcast %cst_37 : f32 to vector<16x128xf32>
    %68 = arith.cmpf ogt, %66, %67 : vector<16x128xf32>
    %cst_38 = arith.constant 1.000000e-01 : f32
    %69 = vector.broadcast %cst_38 : f32 to vector<16x128xf32>
    %70 = arith.mulf %69, %66 : vector<16x128xf32>
    %71 = arith.select %68, %66, %70 : vector<16x128xi1>, vector<16x128xf32>
    %c0_39 = arith.constant 0 : index
    %c0_40 = arith.constant 0 : index
    %72 = vector.load %arg13[%c0_39, %c0_40] : memref<128x128xf32, #tpu.memory_space<vmem>>, vector<128x128xf32>
    %cst_41 = arith.constant dense<0.000000e+00> : vector<16x128xf32>
    %73 = tpu.matmul %71, %72, %cst_41 {dimension_numbers = #tpu.dot_dimension_numbers<[1], [0], [0], [1], [0, 0, 1, 1], [], []>} : vector<16x128xf32>, vector<128x128xf32>, vector<16x128xf32> -> vector<16x128xf32>
    %c0_42 = arith.constant 0 : index
    %c0_43 = arith.constant 0 : index
    %74 = vector.load %arg14[%c0_42, %c0_43] : memref<1x128xf32, #tpu.memory_space<vmem>>, vector<1x128xf32>
    %75 = vector.broadcast %74 : vector<1x128xf32> to vector<16x128xf32>
    %76 = arith.addf %73, %75 : vector<16x128xf32>
    %77 = arith.addf %76, %61 : vector<16x128xf32>
    %c0_44 = arith.constant 0 : index
    %c0_45 = arith.constant 0 : index
    %c0_46 = arith.constant 0 : index
    %78 = vector.load %arg15[%c0_44, %c0_45, %c0_46] : memref<1x16x128xf32, #tpu.memory_space<vmem>>, vector<1x16x128xf32>
    %79 = vector.shape_cast %78 : vector<1x16x128xf32> to vector<16x128xf32>
    %80 = vector.shape_cast %77 : vector<16x128xf32> to vector<1x16x128xf32>
    tpu.vector_store %arg15[%c0_44, %c0_45, %c0_46], %80 {strides = array<i32>} : memref<1x16x128xf32, #tpu.memory_space<vmem>>, vector<1x16x128xf32>,
    return
  }
  func.func @transform_0(%arg0: i32) -> (i32, i32, i32) {
    %c0_i32 = arith.constant 0 : i32
    %c0_i32_0 = arith.constant 0 : i32
    %c0_i32_1 = arith.constant 0 : i32
    return %arg0, %c0_i32, %c0_i32_0 : i32, i32, i32
  }
  func.func @transform_1(%arg0: i32) -> (i32, i32) {
    %c0_i32 = arith.constant 0 : i32
    %c0_i32_0 = arith.constant 0 : i32
    %c0_i32_1 = arith.constant 0 : i32
    return %c0_i32, %c0_i32_0 : i32, i32
  }
  func.func @transform_2(%arg0: i32) -> (i32, i32) {
    %c0_i32 = arith.constant 0 : i32
    %c0_i32_0 = arith.constant 0 : i32
    %c0_i32_1 = arith.constant 0 : i32
    return %c0_i32, %c0_i32_0 : i32, i32
  }
  func.func @transform_3(%arg0: i32) -> (i32, i32) {
    %c0_i32 = arith.constant 0 : i32
    %c0_i32_0 = arith.constant 0 : i32
    %c0_i32_1 = arith.constant 0 : i32
    return %c0_i32, %c0_i32_0 : i32, i32
  }
  func.func @transform_4(%arg0: i32) -> (i32, i32) {
    %c0_i32 = arith.constant 0 : i32
    %c0_i32_0 = arith.constant 0 : i32
    %c0_i32_1 = arith.constant 0 : i32
    return %c0_i32, %c0_i32_0 : i32, i32
  }
  func.func @transform_5(%arg0: i32) -> (i32, i32) {
    %c0_i32 = arith.constant 0 : i32
    %c0_i32_0 = arith.constant 0 : i32
    %c0_i32_1 = arith.constant 0 : i32
    return %c0_i32, %c0_i32_0 : i32, i32
  }
  func.func @transform_6(%arg0: i32) -> (i32, i32) {
    %c0_i32 = arith.constant 0 : i32
    %c0_i32_0 = arith.constant 0 : i32
    %c0_i32_1 = arith.constant 0 : i32
    return %c0_i32, %c0_i32_0 : i32, i32
  }
  func.func @transform_7(%arg0: i32) -> (i32, i32) {
    %c0_i32 = arith.constant 0 : i32
    %c0_i32_0 = arith.constant 0 : i32
    %c0_i32_1 = arith.constant 0 : i32
    return %c0_i32, %c0_i32_0 : i32, i32
  }
  func.func @transform_8(%arg0: i32) -> (i32, i32) {
    %c0_i32 = arith.constant 0 : i32
    %c0_i32_0 = arith.constant 0 : i32
    %c0_i32_1 = arith.constant 0 : i32
    return %c0_i32, %c0_i32_0 : i32, i32
  }
  func.func @transform_9(%arg0: i32) -> (i32, i32) {
    %c0_i32 = arith.constant 0 : i32
    %c0_i32_0 = arith.constant 0 : i32
    %c0_i32_1 = arith.constant 0 : i32
    return %c0_i32, %c0_i32_0 : i32, i32
  }
  func.func @transform_10(%arg0: i32) -> (i32, i32) {
    %c0_i32 = arith.constant 0 : i32
    %c0_i32_0 = arith.constant 0 : i32
    %c0_i32_1 = arith.constant 0 : i32
    return %c0_i32, %c0_i32_0 : i32, i32
  }
  func.func @transform_11(%arg0: i32) -> (i32, i32) {
    %c0_i32 = arith.constant 0 : i32
    %c0_i32_0 = arith.constant 0 : i32
    %c0_i32_1 = arith.constant 0 : i32
    return %c0_i32, %c0_i32_0 : i32, i32
  }
  func.func @transform_12(%arg0: i32) -> (i32, i32) {
    %c0_i32 = arith.constant 0 : i32
    %c0_i32_0 = arith.constant 0 : i32
    %c0_i32_1 = arith.constant 0 : i32
    return %c0_i32, %c0_i32_0 : i32, i32
  }
  func.func @transform_13(%arg0: i32) -> (i32, i32) {
    %c0_i32 = arith.constant 0 : i32
    %c0_i32_0 = arith.constant 0 : i32
    %c0_i32_1 = arith.constant 0 : i32
    return %c0_i32, %c0_i32_0 : i32, i32
  }
  func.func @transform_14(%arg0: i32) -> (i32, i32, i32) {
    %c0_i32 = arith.constant 0 : i32
    %c0_i32_0 = arith.constant 0 : i32
    %c0_i32_1 = arith.constant 0 : i32
    return %arg0, %c0_i32, %c0_i32_0 : i32, i32, i32
  }
}

</mosaic_0001>

<bundles_post_ra>
// kernel: process_block_pallas.1
= control target key start
LH: loop header
LB: loop body
LE: loop exit
PB: predicated region body
PF: predicated region fallthrough
CT: control target
= control target key end

     0   :  { %19 = vsyncpa [#allocation3], 0  ;;  %s1897_s0 = inlined_call_operand.vmem [shape: f32[1,16,128], index: 0, kind: input, shape index: {}]   ;;  %s1898_s1 = inlined_call_operand.vmem [shape: f32[96,16], index: 1, kind: input, shape index: {}]   ;;  %s1899_s2 = inlined_call_operand.vmem [shape: f32[3,128], index: 2, kind: input, shape index: {}]   ;;  %s1900_s3 = inlined_call_operand.vmem [shape: f32[3,128], index: 3, kind: input, shape index: {}]   ;;  %s1901_s4 = inlined_call_operand.vmem [shape: f32[1,128], index: 4, kind: input, shape index: {}]   ;;  %s1902_s5 = inlined_call_operand.vmem [shape: f32[1,128], index: 5, kind: input, shape index: {}]   ;;  %s1903_s6 = inlined_call_operand.hbm [shape: f32[224,128], index: 6, kind: input, shape index: {}]   ;;  %s1904_s7 = inlined_call_operand.hbm [shape: f32[48,224], index: 7, kind: input, shape index: {}]   ;;  %s1905_s8 = inlined_call_operand.vmem [shape: f32[384,128], index: 8, kind: input, shape index: {}]   ;;  %s1906_s9 = inlined_call_operand.vmem [shape: f32[16,128], index: 9, kind: input, shape index: {}]   ;;  %s1907_s10 = inlined_call_operand.vmem [shape: f32[128,128], index: 10, kind: input, shape index: {}]   ;;  %s1908_s11 = inlined_call_operand.vmem [shape: f32[1,128], index: 11, kind: input, shape index: {}]   ;;  %s1909_s12 = inlined_call_operand.hbm [shape: f32[128,128], index: 12, kind: input, shape index: {}]   ;;  %s1910_s13 = inlined_call_operand.vmem [shape: f32[1,128], index: 13, kind: input, shape index: {}]   ;;  %s1911_s14 = inlined_call_operand.vmem [shape: f32[1,16,128], index: 14, kind: output, shape index: {}]  }
   0x1   :  { %20 = vsyncpa [#allocation5], 0  ;;  %s1453_s29 = smov [#allocation4]   ;;  %s1383_s17 = scalar_lea.hbm %s1904_s7, 1536 }
   0x2   :  { %s50_s30 = sshll.u32 %s1453_s29, 4  ;;  %p1384_p0 = scmp.ne.s32.totalorder %s1904_s7, %s1383_s17  ;;  %s51_s30 = int_to_ptr.vmem [resolvable:$true] %s50_s30 }
   0x3   :  { %p1387_p1 = scmp.lt.u32.totalorder %s1383_s17, %s1904_s7 }
   0x5   :  { %p1389_p2 = pnand %p1387_p1, %p1384_p0 }
   0x7   :  { %1392 = shalt.err (!%p1389_p2)
}
   0x8   :  { %s1393_s22 = scalar_lea.vmem %s51_s30, 1536  ;;  %p1398_p4 = scmp.lt.s32.totalorder %s51_s30, %s51_s30 }
   0x9   :  { %p1394_p3 = scmp.ne.s32.totalorder %s51_s30, %s1393_s22  ;;  %p1399_p5 = scmp.lt.s32.totalorder %s1393_s22, %s1393_s22 }
   0xb   :  { %p1400_p6 = por %p1399_p5, %p1398_p4 }
   0xd   :  { %p1401_p7 = pnand %p1400_p6, %p1394_p3 }
   0xf   :  { %1404 = shalt.err (!%p1401_p7)
}
  0x10   :  { %s1454_s23 = smov 256   ;;  %s1455_s24 = smov 16  }
  0x11   :  { %56 = dma.hbm_to_vmem [thread:$0]  %s1904_s7, 1536, %s51_s30, [#allocation5], %s1454_s23, %s1454_s23, %s1455_s24  }
  0x12   :  { %s1456_s27 = smov [#allocation2]   ;;  %s1405_s16 = scalar_lea.hbm %s1903_s6, 3584 }
  0x13   :  { %s38_s28 = sshll.u32 %s1456_s27, 4  ;;  %p1406_p8 = scmp.ne.s32.totalorder %s1903_s6, %s1405_s16  ;;  %s39_s28 = int_to_ptr.vmem [resolvable:$true] %s38_s28 }
  0x14   :  { %p1409_p9 = scmp.lt.u32.totalorder %s1405_s16, %s1903_s6 }
  0x16   :  { %p1411_p10 = pnand %p1409_p9, %p1406_p8 }
  0x18   :  { %1414 = shalt.err (!%p1411_p10)
}
  0x19   :  { %s1415_s21 = scalar_lea.vmem %s39_s28, 3584  ;;  %p1420_p12 = scmp.lt.s32.totalorder %s39_s28, %s39_s28 }
  0x1a   :  { %p1416_p11 = scmp.ne.s32.totalorder %s39_s28, %s1415_s21  ;;  %p1421_p13 = scmp.lt.s32.totalorder %s1415_s21, %s1415_s21 }
  0x1c   :  { %p1422_p0 = por %p1421_p13, %p1420_p12 }
  0x1e   :  { %p1423_p1 = pnand %p1422_p0, %p1416_p11 }
  0x20   :  { %1426 = shalt.err (!%p1423_p1)
}
  0x21   :  { %s1457_s7 = smov 128   ;;  %s1458_s30 = smov 8  }
  0x22   :  { %44 = dma.hbm_to_vmem [thread:$0]  %s1903_s6, 3584, %s39_s28, [#allocation3], %s1457_s7, %s1457_s7, %s1458_s30  }
  0x23   :  { %s1459_s24 = smov [#allocation6]   ;;  %s1427_s29 = scalar_lea.hbm %s1909_s12, 2048 }
  0x24   :  { %s70_s25 = sshll.u32 %s1459_s24, 4  ;;  %p1428_p2 = scmp.ne.s32.totalorder %s1909_s12, %s1427_s29  ;;  %s71_s25 = int_to_ptr.vmem [resolvable:$true] %s70_s25 }
  0x25   :  { %p1431_p3 = scmp.lt.u32.totalorder %s1427_s29, %s1909_s12 }
  0x27   :  { %p1433_p4 = pnand %p1431_p3, %p1428_p2 }
  0x29   :  { %1436 = shalt.err (!%p1433_p4)
}
  0x2a   :  { %s1437_s19 = scalar_lea.vmem %s71_s25, 2048  ;;  %p1442_p6 = scmp.lt.s32.totalorder %s71_s25, %s71_s25 }
  0x2b   :  { %p1438_p5 = scmp.ne.s32.totalorder %s71_s25, %s1437_s19  ;;  %p1443_p7 = scmp.lt.s32.totalorder %s1437_s19, %s1437_s19 }
  0x2d   :  { %p1444_p8 = por %p1443_p7, %p1442_p6 }
  0x2f   :  { %p1445_p9 = pnand %p1444_p8, %p1438_p5 }
  0x31   :  { %1448 = shalt.err (!%p1445_p9)
}
  0x32   :  { %76 = dma.hbm_to_vmem [thread:$0]  %s1909_s12, 2048, %s71_s25, [#allocation5], %s1457_s7, %s1457_s7, %s1458_s30  }
  0x33   :  { %1449 = dma.done.wait [#allocation3], 3584  }
  0x34   :  { %1450 = vsyncadd [#allocation3], 4294963712 }
  0x35   :  { %1451 = dma.done.wait [#allocation5], 3584  }
  0x36   :  { %1452 = vsyncadd [#allocation5], 4294963712  ;;  %vm102_vm0 = vcmask 130048   ;;  %v1575_v0 = vld [vmem:[%s1897_s0] sm:$0xff]  ;;  %v1580_v1 = vld [vmem:[%s1897_s0 + $0x8] sm:$0xff]  ;;  %v1460_v15 = vmov 0.0|0.0  }
  0x37   :  { %v90_v2 = vld [vmem:[%s1898_s1] sm:$0xff]  ;;  %v1201_v3 = vpack.c.bf16 %v1580_v1, %v1575_v0  ;;  %v91_v4 = vld [vmem:[%s1898_s1 + $0x8] sm:$0xff]  ;;  %v92_v5 = vld [vmem:[%s1898_s1 + $0x10] sm:$0xff]  ;;  %vm412_vm1 = vcmask 785408  }
  0x38   :  { %1078 = vmatprep.mubr.msk.f32.mxu1 %vm102_vm0, %v90_v2  ;;  %v93_v6 = vld [vmem:[%s1898_s1 + $0x18] sm:$0xff]  ;;  %v94_v7 = vld [vmem:[%s1898_s1 + $0x20] sm:$0xff]  ;;  %v95_v8 = vld [vmem:[%s1898_s1 + $0x28] sm:$0xff] }
  0x39   :  { %1202 = vmatprep.subr.bf16.mxu1 %v1201_v3  ;;  %v96_v9 = vld [vmem:[%s1898_s1 + $0x30] sm:$0xff]  ;;  %v97_v10 = vld [vmem:[%s1898_s1 + $0x38] sm:$0xff]  ;;  %v98_v11 = vld [vmem:[%s1898_s1 + $0x40] sm:$0xff] }
  0x3a   :  { %1204 = vmatpush3.bf16.msra.mxu1 %v1201_v3  ;;  %v99_v12 = vld [vmem:[%s1898_s1 + $0x48] sm:$0xff]  ;;  %v100_v13 = vld [vmem:[%s1898_s1 + $0x50] sm:$0xff]  ;;  %v101_v14 = vld [vmem:[%s1898_s1 + $0x58] sm:$0xff] }
  0x3b   :  { %1205 = vmatprep.subr.bf16.mxu1 %v1460_v15  ;;  %v401_v16 = vld [vmem:[#allocation4 + $0x8] sm:$0xff]  ;;  %v542_v17 = vld [vmem:[%s1905_s8 + $0x80] sm:$0xff]  ;;  %v544_v22 = vld [vmem:[%s1905_s8 + $0x90] sm:$0xff] }
  0x3c   :  { %v543_v18 = vld [vmem:[%s1905_s8 + $0x88] sm:$0xff]  ;;  %v526_v19 = vld [vmem:[%s1905_s8] sm:$0xff]  ;;  %v545_v23 = vld [vmem:[%s1905_s8 + $0x98] sm:$0xff] }
  0x3d   :  { %1079 = vmatmul.mubr.msk.f32.vlgmr.msra.gmra.mrb[0].mxu1 %vm102_vm0, %v91_v4  ;;  %v1247_v20 = vpack.c.bf16 %v543_v18, %v542_v17  ;;  %v527_v21 = vld [vmem:[%s1905_s8 + $0x8] sm:$0xff]  ;;  %v1251_v25 = vpack.c.bf16 %v545_v23, %v544_v22  ;;  %v528_v26 = vld [vmem:[%s1905_s8 + $0x10] sm:$0xff]  ;;  %v529_v27 = vld [vmem:[%s1905_s8 + $0x18] sm:$0xff] }
  0x3e   :  { %1081 = vmatprep.mubr.msk.f32.mxu1 %vm102_vm0, %v92_v5  ;;  %v1249_v24 = vpack.c.bf16 %v527_v21, %v526_v19  ;;  %v546_v28 = vld [vmem:[%s1905_s8 + $0xa0] sm:$0xff]  ;;  %v547_v29 = vld [vmem:[%s1905_s8 + $0xa8] sm:$0xff]  ;;  %v1253_v30 = vpack.c.bf16 %v529_v27, %v528_v26  ;;  %v548_v34 = vld [vmem:[%s1905_s8 + $0xb0] sm:$0xff] }
  0x3f   :  { %1248 = vmatprep.subr.bf16.mxu0 %v1247_v20  ;;  %v1255_v31 = vpack.c.bf16 %v547_v29, %v546_v28  ;;  %v530_v32 = vld [vmem:[%s1905_s8 + $0x20] sm:$0xff]  ;;  %v531_v33 = vld [vmem:[%s1905_s8 + $0x28] sm:$0xff]  ;;  %v549_v35 = vld [vmem:[%s1905_s8 + $0xb8] sm:$0xff] }
  0x40   :  { %1250 = vmatpush3.bf16.msra.mxu0 %v1249_v24  ;;  %v1257_v36 = vpack.c.bf16 %v531_v33, %v530_v32  ;;  %v1259_v37 = vpack.c.bf16 %v549_v35, %v548_v34  ;;  %v532_v38 = vld [vmem:[%s1905_s8 + $0x30] sm:$0xff]  ;;  %v533_v39 = vld [vmem:[%s1905_s8 + $0x38] sm:$0xff]  ;;  %v550_v40 = vld [vmem:[%s1905_s8 + $0xc0] sm:$0xff] }
  0x41   :  { %1082 = vmatmul.mubr.msk.f32.gmra.mrb[2].mxu1 %vm102_vm0, %v93_v6  ;;  %1252 = vmatprep.subr.bf16.mxu0 %v1251_v25  ;;  %v551_v41 = vld [vmem:[%s1905_s8 + $0xc8] sm:$0xff]  ;;  %v1261_v42 = vpack.c.bf16 %v533_v39, %v532_v38  ;;  %v534_v44 = vld [vmem:[%s1905_s8 + $0x40] sm:$0xff]  ;;  %v552_v46 = vld [vmem:[%s1905_s8 + $0xd0] sm:$0xff] }
  0x42   :  { %1084 = vmatprep.mubr.msk.f32.mxu1 %vm102_vm0, %v94_v7  ;;  %v1263_v43 = vpack.c.bf16 %v551_v41, %v550_v40  ;;  %v535_v45 = vld [vmem:[%s1905_s8 + $0x48] sm:$0xff]  ;;  %v553_v47 = vld [vmem:[%s1905_s8 + $0xd8] sm:$0xff]  ;;  %v536_v50 = vld [vmem:[%s1905_s8 + $0x50] sm:$0xff] }
  0x43   :  { %v1265_v48 = vpack.c.bf16 %v535_v45, %v534_v44  ;;  %v1267_v49 = vpack.c.bf16 %v553_v47, %v552_v46  ;;  %v537_v51 = vld [vmem:[%s1905_s8 + $0x58] sm:$0xff]  ;;  %v952_v53 = vld [vmem:[%s1899_s2] ss:$0 sm:$0xff]  ;;  %v956_v59 = vld [vmem:[%s1899_s2 + $0x1] ss:$0 sm:$0xff] }
  0x44   :  { %1254 = vmatpush3.bf16.msra.mxu0 %v1253_v30  ;;  %v1269_v52 = vpack.c.bf16 %v537_v51, %v536_v50  ;;  %v953_v57 = vld [vmem:[%s1901_s4] ss:$0 sm:$0xff]  ;;  %v958_v4 = vld [vmem:[%s1899_s2 + $0x2] ss:$0 sm:$0xff]  ;;  %v347_v18 = vld [vmem:[#allocation2 + $0x18] sm:$0xff] }
  0x45   :  { %1085 = vmatmul.mubr.msk.f32.gmra.mrb[4].mxu1 %vm102_vm0, %v95_v8  ;;  %1256 = vmatprep.subr.bf16.mxu0 %v1255_v31  ;;  %v955_v17 = vld [vmem:[%s1902_s5] ss:$0 sm:$0xff]  ;;  %v346_v22 = vld [vmem:[#allocation2 + $0x10] sm:$0xff]  ;;  %v957_v26 = vld [vmem:[%s1900_s3 + $0x1] ss:$0 sm:$0xff] }
  0x46   :  { %1087 = vmatprep.mubr.msk.f32.mxu1 %vm102_vm0, %v96_v9  ;;  %v344_v20 = vld [vmem:[#allocation2] sm:$0xff]  ;;  %v349_v30 = vld [vmem:[#allocation2 + $0x28] sm:$0xff]  ;;  %v350_v31 = vld [vmem:[#allocation2 + $0x30] sm:$0xff] }
  0x47   :  { %v348_v27 = vld [vmem:[#allocation2 + $0x20] sm:$0xff]  ;;  %v351_v32 = vld [vmem:[#allocation2 + $0x38] sm:$0xff]  ;;  %v353_v44 = vld [vmem:[#allocation2 + $0x48] sm:$0xff] }
  0x48   :  { %1258 = vmatpush3.bf16.msra.mxu0 %v1257_v36  ;;  %v352_v38 = vld [vmem:[#allocation2 + $0x40] sm:$0xff]  ;;  %v355_v45 = vld [vmem:[#allocation2 + $0x58] sm:$0xff]  ;;  %v354_v51 = vld [vmem:[#allocation2 + $0x50] sm:$0xff] }
  0x49   :  { %1088 = vmatmul.mubr.msk.f32.gmra.mrb[6].mxu1 %vm102_vm0, %v97_v10  ;;  %1260 = vmatprep.subr.bf16.mxu0 %v1259_v37  ;;  %v959_v47 = vld [vmem:[%s1900_s3 + $0x2] ss:$0 sm:$0xff] }
  0x4a   :  { %1090 = vmatprep.mubr.msk.f32.mxu1 %vm102_vm0, %v98_v11  ;;  %v954_v11 = vld [vmem:[%s1900_s3] ss:$0 sm:$0xff] }
  0x4c   :  { %1262 = vmatpush3.bf16.msra.mxu0 %v1261_v42 }
  0x4d   :  { %1091 = vmatmul.mubr.msk.f32.gmra.mrb[8].mxu1 %vm102_vm0, %v99_v12  ;;  %1264 = vmatprep.subr.bf16.mxu0 %v1263_v43 }
  0x4e   :  { %1093 = vmatprep.mubr.msk.f32.mxu1 %vm102_vm0, %v100_v13 }
  0x50   :  { %1266 = vmatpush3.bf16.msra.mxu0 %v1265_v48 }
  0x51   :  { %1094 = vmatmul.mubr.msk.f32.gmra.mrb[10].mxu1 %vm102_vm0, %v101_v14  ;;  %1268 = vmatprep.subr.bf16.mxu0 %v1267_v49  ;;  %v345_v14 = vld [vmem:[#allocation2 + $0x8] sm:$0xff] }
  0x52   :  { %960 = vmatprep.mubr.msk.f32.mxu1 %vm412_vm1, %v401_v16 }
  0x54   :  { %1270 = vmatpush3.bf16.msra.mxu0 %v1269_v52  ;;  %v356_v52 = vld [vmem:[#allocation2 + $0x60] sm:$0xff] }
 0x110   :  { %v1080_v54 = vpop.f32.mrb[0].mxu1 }
 0x111   :  { %v272_v55 = vmul.f32 %v1080_v54, %v952_v53  ;;  %v205_v56 = vpop.f32.mrb[1].mxu1 }
 0x112   :  { %v271_v58 = vmul.f32 %v952_v53, %v205_v56 }
 0x113   :  { %v280_v61 = vadd.f32 %v953_v57, %v272_v55 }
 0x114   :  { %v1083_v60 = vpop.f32.mrb[2].mxu1  ;;  %v279_v2 = vadd.f32 %v953_v57, %v271_v58  ;;  %v357_v57 = vld [vmem:[#allocation2 + $0x68] sm:$0xff] }
 0x115   :  { %v302_v62 = vmul.f32 %v1083_v60, %v956_v59  ;;  %v215_v63 = vpop.f32.mrb[3].mxu1 }
 0x116   :  { %v301_v3 = vmul.f32 %v956_v59, %v215_v63 }
 0x117   :  { %v304_v5 = vadd.f32 %v302_v62, %v280_v61 }
 0x118   :  { %v303_v6 = vadd.f32 %v301_v3, %v279_v2  ;;  %v1086_v7 = vpop.f32.mrb[4].mxu1 }
 0x119   :  { %v320_v8 = vmul.f32 %v1086_v7, %v958_v4  ;;  %v225_v9 = vpop.f32.mrb[5].mxu1 }
 0x11a   :  { %v319_v10 = vmul.f32 %v958_v4, %v225_v9 }
 0x11b   :  { %v322_v12 = vadd.f32 %v320_v8, %v304_v5 }
 0x11c   :  { %v321_v13 = vadd.f32 %v319_v10, %v303_v6  ;;  %v1089_v16 = vpop.f32.mrb[6].mxu1 }
 0x11d   :  { %vm333_vm2 = vcmp.gt.f32.partialorder %v322_v12, 0.0  ;;  %v335_v19 = vmul.f32 0.1, %v322_v12  ;;  %v287_v21 = vmul.f32 %v1089_v16, %v954_v11  ;;  %v235_v23 = vpop.f32.mrb[7].mxu1 }
 0x11e   :  { %vm332_vm3 = vcmp.gt.f32.partialorder %v321_v13, 0.0  ;;  %v334_v24 = vmul.f32 0.1, %v321_v13  ;;  %v286_v25 = vmul.f32 %v954_v11, %v235_v23  ;;  %v365_v23 = vld [vmem:[#allocation2 + $0xa8] sm:$0xff] }
 0x11f   :  { %v337_v28 = vsel %vm333_vm2, %v322_v12, %v335_v19  ;;  %v295_v29 = vadd.f32 %v955_v17, %v287_v21  ;;  %v363_v19 = vld [vmem:[#allocation2 + $0x98] sm:$0xff]  ;;  %v362_v21 = vld [vmem:[#allocation2 + $0x90] sm:$0xff] }
 0x120   :  { %v336_v33 = vsel %vm332_vm3, %v321_v13, %v334_v24  ;;  %v373_v34 = vmul.f32 %v345_v14, %v337_v28  ;;  %v375_v35 = vmul.f32 %v347_v18, %v337_v28  ;;  %v294_v36 = vadd.f32 %v955_v17, %v286_v25  ;;  %v1092_v37 = vpop.f32.mrb[8].mxu1  ;;  %v358_v13 = vld [vmem:[#allocation2 + $0x70] sm:$0xff]  ;;  %v359_v14 = vld [vmem:[#allocation2 + $0x78] sm:$0xff]  ;;  %v360_v17 = vld [vmem:[#allocation2 + $0x80] sm:$0xff] }
 0x121   :  { %v372_v39 = vmul.f32 %v344_v20, %v336_v33  ;;  %v374_v40 = vmul.f32 %v346_v22, %v336_v33  ;;  %v311_v41 = vmul.f32 %v1092_v37, %v957_v26  ;;  %v245_v42 = vpop.f32.mrb[9].mxu1  ;;  %v376_v43 = vmul.f32 %v348_v27, %v336_v33  ;;  %v361_v18 = vld [vmem:[#allocation2 + $0x88] sm:$0xff]  ;;  %v364_v22 = vld [vmem:[#allocation2 + $0xa0] sm:$0xff]  ;;  %v366_v25 = vld [vmem:[#allocation2 + $0xb0] sm:$0xff] }
 0x122   :  { %v310_v46 = vmul.f32 %v957_v26, %v245_v42  ;;  %v377_v48 = vmul.f32 %v349_v30, %v337_v28  ;;  %v1730_v49 = vmul.f32 %v350_v31, %v336_v33  ;;  %v1732_v50 = vmul.f32 %v351_v32, %v337_v28  ;;  %v367_v26 = vld [vmem:[#allocation2 + $0xb8] sm:$0xff]  ;;  %v368_v27 = vld [vmem:[#allocation2 + $0xc0] sm:$0xff]  ;;  %v369_v32 = vld [vmem:[#allocation2 + $0xc8] sm:$0xff] }
 0x123   :  { %v1206_v53 = vpack.c.bf16 %v373_v34, %v372_v39  ;;  %v1209_v54 = vpack.c.bf16 %v375_v35, %v374_v40  ;;  %v313_v55 = vadd.f32 %v311_v41, %v295_v29  ;;  %v1734_v56 = vmul.f32 %v352_v38, %v336_v33  ;;  %v370_v37 = vld [vmem:[#allocation2 + $0xd0] sm:$0xff]  ;;  %v371_v38 = vld [vmem:[#allocation2 + $0xd8] sm:$0xff] }
 0x124   :  { %v312_v58 = vadd.f32 %v310_v46, %v294_v36  ;;  %v1095_v59 = vpop.f32.mrb[10].mxu1  ;;  %v1212_v60 = vpack.c.bf16 %v377_v48, %v376_v43  ;;  %v1215_v61 = vpack.c.bf16 %v1732_v50, %v1730_v49  ;;  %v381_v62 = vmul.f32 %v353_v44, %v337_v28 }
 0x125   :  { %1207 = vmatpush1.bf16.msra.mxu1 %v1206_v53  ;;  %v329_v63 = vmul.f32 %v1095_v59, %v959_v47  ;;  %v255_v2 = vpop.f32.mrb[11].mxu1  ;;  %v382_v3 = vmul.f32 %v354_v51, %v336_v33  ;;  %v383_v4 = vmul.f32 %v355_v45, %v337_v28  ;;  %v384_v5 = vmul.f32 %v356_v52, %v336_v33  ;;  %v400_v53 = vld [vmem:[#allocation4] sm:$0xff]  ;;  %v406_v59 = vld [vmem:[#allocation4 + $0x30] sm:$0xff] }
 0x126   :  { %1208 = vmatprep.subr.bf16.mxu1 %v1460_v15  ;;  %v328_v6 = vmul.f32 %v959_v47, %v255_v2  ;;  %v1218_v7 = vpack.c.bf16 %v381_v62, %v1734_v56  ;;  %v385_v8 = vmul.f32 %v357_v57, %v337_v28  ;;  %v405_v56 = vld [vmem:[#allocation4 + $0x28] sm:$0xff]  ;;  %v404_v57 = vld [vmem:[#allocation4 + $0x20] sm:$0xff]  ;;  %v410_v62 = vld [vmem:[#allocation4 + $0x50] sm:$0xff] }
 0x127   :  { %v331_v9 = vadd.f32 %v329_v63, %v313_v55  ;;  %v1221_v10 = vpack.c.bf16 %v383_v4, %v382_v3  ;;  %v402_v55 = vld [vmem:[#allocation4 + $0x10] sm:$0xff]  ;;  %v554_v63 = vld [vmem:[%s1905_s8 + $0xe0] sm:$0xff]  ;;  %v555_v2 = vld [vmem:[%s1905_s8 + $0xe8] sm:$0xff] }
 0x128   :  { %v330_v11 = vadd.f32 %v328_v6, %v312_v58  ;;  %v1224_v12 = vpack.c.bf16 %v385_v8, %v384_v5  ;;  %v407_v58 = vld [vmem:[#allocation4 + $0x38] sm:$0xff]  ;;  %v538_v3 = vld [vmem:[%s1905_s8 + $0x60] sm:$0xff]  ;;  %v1271_v4 = vpack.c.bf16 %v555_v2, %v554_v63  ;;  %v539_v5 = vld [vmem:[%s1905_s8 + $0x68] sm:$0xff] }
 0x129   :  { %1210 = vmatpush1.bf16.msra.mxu1 %v1209_v54  ;;  %vm339_vm4 = vcmp.gt.f32.partialorder %v331_v9, 0.0  ;;  %v341_v16 = vmul.f32 0.1, %v331_v9  ;;  %v403_v54 = vld [vmem:[#allocation4 + $0x18] sm:$0xff]  ;;  %v1273_v6 = vpack.c.bf16 %v539_v5, %v538_v3  ;;  %v738_v2 = vld [vmem:[%s1907_s10 + $0x50] sm:$0xff]  ;;  %v740_v5 = vld [vmem:[%s1907_s10 + $0x60] sm:$0xff] }
 0x12a   :  { %1211 = vmatprep.subr.bf16.mxu1 %v1460_v15  ;;  %vm338_vm5 = vcmp.gt.f32.partialorder %v330_v11, 0.0  ;;  %v340_v20 = vmul.f32 0.1, %v330_v11  ;;  %1272 = vmatprep.subr.bf16.mxu0 %v1271_v4  ;;  %v557_v8 = vld [vmem:[%s1905_s8 + $0xf8] sm:$0xff] }
 0x12b   :  { %v343_v24 = vsel %vm339_vm4, %v331_v9, %v341_v16  ;;  %1274 = vmatpush3.bf16.msra.mxu0 %v1273_v6  ;;  %v540_v9 = vld [vmem:[%s1905_s8 + $0x70] sm:$0xff]  ;;  %v739_v3 = vld [vmem:[%s1907_s10 + $0x58] sm:$0xff]  ;;  %v741_v6 = vld [vmem:[%s1907_s10 + $0x68] sm:$0xff] }
 0x12c   :  { %v342_v28 = vsel %vm338_vm5, %v330_v11, %v340_v20  ;;  %v387_v29 = vmul.f32 %v359_v14, %v343_v24  ;;  %v389_v30 = vmul.f32 %v361_v18, %v343_v24  ;;  %v391_v31 = vmul.f32 %v363_v19, %v343_v24  ;;  %v541_v11 = vld [vmem:[%s1905_s8 + $0x78] sm:$0xff]  ;;  %v559_v14 = vld [vmem:[%s1905_s8 + $0x108] sm:$0xff] }
 0x12d   :  { %1213 = vmatpush1.bf16.msra.mxu1 %v1212_v60  ;;  %v386_v33 = vmul.f32 %v358_v13, %v342_v28  ;;  %v388_v34 = vmul.f32 %v360_v17, %v342_v28  ;;  %v390_v35 = vmul.f32 %v362_v21, %v342_v28  ;;  %v392_v36 = vmul.f32 %v364_v22, %v342_v28  ;;  %v409_v60 = vld [vmem:[#allocation4 + $0x48] sm:$0xff]  ;;  %v558_v13 = vld [vmem:[%s1905_s8 + $0x100] sm:$0xff]  ;;  %v560_v21 = vld [vmem:[%s1905_s8 + $0x110] sm:$0xff] }
 0x12e   :  { %1214 = vmatprep.subr.bf16.mxu1 %v1460_v15  ;;  %v393_v39 = vmul.f32 %v365_v23, %v343_v24  ;;  %v394_v40 = vmul.f32 %v366_v25, %v342_v28  ;;  %v395_v41 = vmul.f32 %v367_v26, %v343_v24  ;;  %v396_v42 = vmul.f32 %v368_v27, %v342_v28  ;;  %v561_v22 = vld [vmem:[%s1905_s8 + $0x118] sm:$0xff]  ;;  %v562_v26 = vld [vmem:[%s1905_s8 + $0x120] sm:$0xff]  ;;  %v563_v27 = vld [vmem:[%s1905_s8 + $0x128] sm:$0xff] }
 0x12f   :  { %v1227_v43 = vpack.c.bf16 %v387_v29, %v386_v33  ;;  %v1230_v44 = vpack.c.bf16 %v389_v30, %v388_v34  ;;  %v1233_v45 = vpack.c.bf16 %v391_v31, %v390_v35  ;;  %v397_v46 = vmul.f32 %v369_v32, %v343_v24  ;;  %v564_v30 = vld [vmem:[%s1905_s8 + $0x130] sm:$0xff]  ;;  %v565_v31 = vld [vmem:[%s1905_s8 + $0x138] sm:$0xff]  ;;  %v566_v35 = vld [vmem:[%s1905_s8 + $0x140] sm:$0xff] }
 0x130   :  { %v1236_v47 = vpack.c.bf16 %v393_v39, %v392_v36  ;;  %v1239_v48 = vpack.c.bf16 %v395_v41, %v394_v40  ;;  %v398_v49 = vmul.f32 %v370_v37, %v342_v28  ;;  %v399_v50 = vmul.f32 %v371_v38, %v343_v24  ;;  %v567_v36 = vld [vmem:[%s1905_s8 + $0x148] sm:$0xff]  ;;  %v568_v40 = vld [vmem:[%s1905_s8 + $0x150] sm:$0xff]  ;;  %v569_v41 = vld [vmem:[%s1905_s8 + $0x158] sm:$0xff] }
 0x131   :  { %1216 = vmatpush1.bf16.msra.mxu1 %v1215_v61  ;;  %v1242_v51 = vpack.c.bf16 %v397_v46, %v396_v42  ;;  %v411_v61 = vld [vmem:[#allocation4 + $0x58] sm:$0xff]  ;;  %v1279_v16 = vpack.c.bf16 %v559_v14, %v558_v13  ;;  %v1283_v24 = vpack.c.bf16 %v561_v22, %v560_v21  ;;  %v1287_v29 = vpack.c.bf16 %v563_v27, %v562_v26  ;;  %v834_v13 = vld [vmem:[#allocation6 + $0x10] sm:$0xff] }
 0x132   :  { %1217 = vmatprep.subr.bf16.mxu1 %v1460_v15  ;;  %v1245_v52 = vpack.c.bf16 %v399_v50, %v398_v49  ;;  %v1291_v33 = vpack.c.bf16 %v565_v31, %v564_v30  ;;  %v1295_v38 = vpack.c.bf16 %v567_v36, %v566_v35  ;;  %v728_v50 = vld [vmem:[%s1907_s10] sm:$0xff]  ;;  %v1331_v4 = vpack.c.bf16 %v739_v3, %v738_v2  ;;  %v838_v21 = vld [vmem:[#allocation6 + $0x30] sm:$0xff]  ;;  %v839_v22 = vld [vmem:[#allocation6 + $0x38] sm:$0xff] }
 0x133   :  { %v842_v27 = vld [vmem:[#allocation6 + $0x50] sm:$0xff]  ;;  %v575_v36 = vld [vmem:[%s1906_s9 + $0x8] sm:$0xff] }
 0x135   :  { %1219 = vmatpush1.bf16.msra.mxu1 %v1218_v7  ;;  %v556_v7 = vld [vmem:[%s1905_s8 + $0xf0] sm:$0xff] }
 0x136   :  { %1220 = vmatprep.subr.bf16.mxu1 %v1460_v15 }
 0x139   :  { %1222 = vmatpush1.bf16.msra.mxu1 %v1221_v10  ;;  %v1275_v10 = vpack.c.bf16 %v557_v8, %v556_v7  ;;  %v1335_v7 = vpack.c.bf16 %v741_v6, %v740_v5  ;;  %v742_v8 = vld [vmem:[%s1907_s10 + $0x70] sm:$0xff] }
 0x13a   :  { %1223 = vmatprep.subr.bf16.mxu1 %v1460_v15 }
 0x13b   :  { %1276 = vmatprep.subr.bf16.mxu0 %v1275_v10 }
 0x13d   :  { %1225 = vmatpush1.bf16.msra.mxu1 %v1224_v12  ;;  %v1277_v12 = vpack.c.bf16 %v541_v11, %v540_v9  ;;  %v743_v9 = vld [vmem:[%s1907_s10 + $0x78] sm:$0xff]  ;;  %v832_v11 = vld [vmem:[#allocation6] sm:$0xff] }
 0x13e   :  { %1226 = vmatprep.subr.bf16.mxu1 %v1460_v15  ;;  %v1339_v10 = vpack.c.bf16 %v743_v9, %v742_v8 }
 0x13f   :  { %1278 = vmatpush3.bf16.msra.mxu0 %v1277_v12  ;;  %v833_v12 = vld [vmem:[#allocation6 + $0x8] sm:$0xff] }
 0x140   :  { %1280 = vmatprep.subr.bf16.mxu0 %v1279_v16  ;;  %v1343_v14 = vpack.c.bf16 %v833_v12, %v832_v11 }
 0x141   :  { %1228 = vmatpush1.bf16.msra.mxu1 %v1227_v43  ;;  %v1299_v43 = vpack.c.bf16 %v569_v41, %v568_v40 }
 0x142   :  { %1229 = vmatprep.subr.bf16.mxu1 %v1460_v15 }
 0x145   :  { %1231 = vmatpush1.bf16.msra.mxu1 %v1230_v44  ;;  %v570_v44 = vld [vmem:[%s1905_s8 + $0x160] sm:$0xff] }
 0x146   :  { %1232 = vmatprep.subr.bf16.mxu1 %v1460_v15 }
 0x149   :  { %1234 = vmatpush1.bf16.msra.mxu1 %v1233_v45  ;;  %v571_v45 = vld [vmem:[%s1905_s8 + $0x168] sm:$0xff] }
 0x14a   :  { %1235 = vmatprep.subr.bf16.mxu1 %v1460_v15  ;;  %v1303_v46 = vpack.c.bf16 %v571_v45, %v570_v44 }
 0x14d   :  { %1237 = vmatpush1.bf16.msra.mxu1 %v1236_v47  ;;  %v572_v47 = vld [vmem:[%s1905_s8 + $0x170] sm:$0xff] }
 0x14e   :  { %1238 = vmatprep.subr.bf16.mxu1 %v1460_v15 }
 0x151   :  { %1240 = vmatpush1.bf16.msra.mxu1 %v1239_v48  ;;  %v573_v48 = vld [vmem:[%s1905_s8 + $0x178] sm:$0xff] }
 0x152   :  { %1241 = vmatprep.subr.bf16.mxu1 %v1460_v15  ;;  %v1307_v49 = vpack.c.bf16 %v573_v48, %v572_v47  ;;  %v845_v47 = vld [vmem:[#allocation6 + $0x68] sm:$0xff] }
 0x155   :  { %1243 = vmatpush1.bf16.msra.mxu1 %v1242_v51  ;;  %v729_v51 = vld [vmem:[%s1907_s10 + $0x8] sm:$0xff] }
 0x156   :  { %1244 = vmatprep.subr.bf16.mxu1 %v1460_v15  ;;  %v408_v15 = vld [vmem:[#allocation4 + $0x40] sm:$0xff] }
 0x159   :  { %1246 = vmatpush1.bf16.msra.mxu1 %v1245_v52  ;;  %v730_v52 = vld [vmem:[%s1907_s10 + $0x10] sm:$0xff] }
 0x15c   :  { %496 = vmatmul.mubr.f32.vlgmr.msra.gmra.mrb[12].mxu1 %v400_v53  ;;  %v1311_v53 = vpack.c.bf16 %v729_v51, %v728_v50  ;;  %v847_v50 = vld [vmem:[#allocation6 + $0x78] sm:$0xff] }
 0x15d   :  { %961 = vmatprep.mubr.msk.f32.mxu1 %vm412_vm1, %v403_v54  ;;  %v731_v54 = vld [vmem:[%s1907_s10 + $0x18] sm:$0xff] }
 0x15e   :  { %1312 = vmatprep.subr.bf16.mxu1 %v1311_v53 }
 0x15f   :  { %1314 = vmatpush3.bf16.msra.mxu1 %v1311_v53 }
 0x160   :  { %501 = vmatmul.mubr.f32.gmra.mrb[14].mxu1 %v402_v55  ;;  %v1315_v55 = vpack.c.bf16 %v731_v54, %v730_v52  ;;  %v966_v52 = vld [vmem:[%s1908_s11] ss:$0 sm:$0xff] }
 0x161   :  { %962 = vmatprep.mubr.msk.f32.mxu1 %vm412_vm1, %v405_v56  ;;  %v732_v56 = vld [vmem:[%s1907_s10 + $0x20] sm:$0xff] }
 0x162   :  { %1316 = vmatprep.subr.bf16.mxu1 %v1315_v55 }
 0x163   :  { %1318 = vmatpush3.bf16.msra.mxu1 %v1315_v55 }
 0x164   :  { %506 = vmatmul.mubr.f32.gmra.mrb[16].mxu1 %v404_v57  ;;  %v733_v57 = vld [vmem:[%s1907_s10 + $0x28] sm:$0xff] }
 0x165   :  { %963 = vmatprep.mubr.msk.f32.mxu1 %vm412_vm1, %v407_v58  ;;  %v1319_v58 = vpack.c.bf16 %v733_v57, %v732_v56 }
 0x167   :  { %1320 = vmatprep.subr.bf16.mxu1 %v1319_v58 }
 0x168   :  { %511 = vmatmul.mubr.f32.gmra.mrb[18].mxu1 %v406_v59  ;;  %v734_v59 = vld [vmem:[%s1907_s10 + $0x30] sm:$0xff] }
 0x169   :  { %964 = vmatprep.mubr.msk.f32.mxu1 %vm412_vm1, %v409_v60  ;;  %v735_v60 = vld [vmem:[%s1907_s10 + $0x38] sm:$0xff]  ;;  %1322 = vmatpush3.bf16.msra.mxu1 %v1319_v58 }
 0x16c   :  { %516 = vmatmul.mubr.f32.gmra.mrb[20].mxu1 %v408_v15  ;;  %v1323_v15 = vpack.c.bf16 %v735_v60, %v734_v59  ;;  %v967_v59 = vld [vmem:[%s1910_s13] ss:$0 sm:$0xff] }
 0x16d   :  { %965 = vmatprep.mubr.msk.f32.mxu1 %vm412_vm1, %v411_v61  ;;  %v736_v61 = vld [vmem:[%s1907_s10 + $0x40] sm:$0xff] }
 0x16e   :  { %1324 = vmatprep.subr.bf16.mxu1 %v1323_v15 }
 0x16f   :  { %1326 = vmatpush3.bf16.msra.mxu1 %v1323_v15 }
 0x170   :  { %521 = vmatmul.mubr.f32.gmra.mrb[22].mxu1 %v410_v62  ;;  %v737_v62 = vld [vmem:[%s1907_s10 + $0x48] sm:$0xff] }
 0x171   :  { %v1327_v63 = vpack.c.bf16 %v737_v62, %v736_v61 }
 0x173   :  { %1328 = vmatprep.subr.bf16.mxu1 %v1327_v63 }
 0x174   :  { %1330 = vmatpush3.bf16.msra.mxu1 %v1327_v63 }
 0x175   :  { %1332 = vmatprep.subr.bf16.mxu1 %v1331_v4 }
 0x178   :  { %1334 = vmatpush3.bf16.msra.mxu1 %v1331_v4 }
 0x179   :  { %1336 = vmatprep.subr.bf16.mxu1 %v1335_v7 }
 0x17c   :  { %1338 = vmatpush3.bf16.msra.mxu1 %v1335_v7 }
 0x17d   :  { %1340 = vmatprep.subr.bf16.mxu1 %v1339_v10 }
 0x180   :  { %1342 = vmatpush3.bf16.msra.mxu1 %v1339_v10 }
 0x22f   :  { %v497_v17 = vpop.f32.mrb[12].mxu1 }
 0x230   :  { %v499_v18 = vpop.f32.mrb[13].mxu1 }
 0x231   :  { %v836_v18 = vld [vmem:[#allocation6 + $0x20] sm:$0xff] }
 0x233   :  { %v502_v19 = vpop.f32.mrb[14].mxu1 }
 0x234   :  { %v504_v20 = vpop.f32.mrb[15].mxu1 }
 0x237   :  { %v507_v23 = vpop.f32.mrb[16].mxu1 }
 0x238   :  { %v509_v25 = vpop.f32.mrb[17].mxu1  ;;  %640 = vmatprep.mubr.f32.mxu0 %v507_v23  ;;  %v1355_v23 = vpack.c.bf16 %v839_v22, %v838_v21 }
 0x239   :  { %641 = vmatmul.mubr.f32.vlgmr.msra.gmra.mrb[0].mxu0 %v497_v17  ;;  %v841_v25 = vld [vmem:[#allocation6 + $0x48] sm:$0xff] }
 0x23a   :  { %1282 = vmatpush3.bf16.msra.mxu0 %v1279_v16  ;;  %v835_v16 = vld [vmem:[#allocation6 + $0x18] sm:$0xff] }
 0x23b   :  { %v512_v28 = vpop.f32.mrb[18].mxu1  ;;  %1284 = vmatprep.subr.bf16.mxu0 %v1283_v24  ;;  %v1347_v17 = vpack.c.bf16 %v835_v16, %v834_v13 }
 0x23c   :  { %645 = vmatprep.mubr.f32.mxu0 %v512_v28  ;;  %v514_v32 = vpop.f32.mrb[19].mxu1  ;;  %v843_v28 = vld [vmem:[#allocation6 + $0x58] sm:$0xff] }
 0x23d   :  { %646 = vmatmul.mubr.f32.gmra.mrb[2].mxu0 %v502_v19  ;;  %v837_v19 = vld [vmem:[#allocation6 + $0x28] sm:$0xff] }
 0x23e   :  { %1286 = vmatpush3.bf16.msra.mxu0 %v1283_v24  ;;  %v1351_v20 = vpack.c.bf16 %v837_v19, %v836_v18  ;;  %v840_v24 = vld [vmem:[#allocation6 + $0x40] sm:$0xff] }
 0x23f   :  { %1288 = vmatprep.subr.bf16.mxu0 %v1287_v29  ;;  %v517_v34 = vpop.f32.mrb[20].mxu1  ;;  %v1359_v26 = vpack.c.bf16 %v841_v25, %v840_v24 }
 0x240   :  { %v519_v37 = vpop.f32.mrb[21].mxu1  ;;  %1128 = vmatprep.mubr.f32.mxu0 %v517_v34 }
 0x241   :  { %v574_v37 = vld [vmem:[%s1906_s9] sm:$0xff] }
 0x242   :  { %1290 = vmatpush3.bf16.msra.mxu0 %v1287_v29  ;;  %v1363_v29 = vpack.c.bf16 %v843_v28, %v842_v27 }
 0x243   :  { %1292 = vmatprep.subr.bf16.mxu0 %v1291_v33  ;;  %v522_v39 = vpop.f32.mrb[22].mxu1 }
 0x244   :  { %v524_v42 = vpop.f32.mrb[23].mxu1 }
 0x246   :  { %1294 = vmatpush3.bf16.msra.mxu0 %v1291_v33 }
 0x247   :  { %1296 = vmatprep.subr.bf16.mxu0 %v1295_v38 }
 0x24a   :  { %1298 = vmatpush3.bf16.msra.mxu0 %v1295_v38 }
 0x24b   :  { %1300 = vmatprep.subr.bf16.mxu0 %v1299_v43 }
 0x24e   :  { %1302 = vmatpush3.bf16.msra.mxu0 %v1299_v43 }
 0x24f   :  { %1304 = vmatprep.subr.bf16.mxu0 %v1303_v46 }
 0x252   :  { %1306 = vmatpush3.bf16.msra.mxu0 %v1303_v46  ;;  %v844_v46 = vld [vmem:[#allocation6 + $0x60] sm:$0xff] }
 0x253   :  { %1308 = vmatprep.subr.bf16.mxu0 %v1307_v49  ;;  %v1367_v48 = vpack.c.bf16 %v845_v47, %v844_v46 }
 0x256   :  { %1310 = vmatpush3.bf16.msra.mxu0 %v1307_v49  ;;  %v846_v49 = vld [vmem:[#allocation6 + $0x70] sm:$0xff] }
 0x257   :  { %1344 = vmatprep.subr.bf16.mxu0 %v1343_v14  ;;  %v1371_v51 = vpack.c.bf16 %v847_v50, %v846_v49 }
 0x259   :  { %1129 = vmatmul.mubr.f32.vlgmr.msra.gmra.mrb[4].mxu0 %v522_v39 }
 0x25a   :  { %1346 = vmatpush3.bf16.msra.mxu0 %v1343_v14 }
 0x25b   :  { %1348 = vmatprep.subr.bf16.mxu0 %v1347_v17 }
 0x25e   :  { %1350 = vmatpush3.bf16.msra.mxu0 %v1347_v17 }
 0x25f   :  { %1352 = vmatprep.subr.bf16.mxu0 %v1351_v20 }
 0x262   :  { %1354 = vmatpush3.bf16.msra.mxu0 %v1351_v20 }
 0x263   :  { %1356 = vmatprep.subr.bf16.mxu0 %v1355_v23 }
 0x266   :  { %1358 = vmatpush3.bf16.msra.mxu0 %v1355_v23 }
 0x267   :  { %1360 = vmatprep.subr.bf16.mxu0 %v1359_v26 }
 0x26a   :  { %1362 = vmatpush3.bf16.msra.mxu0 %v1359_v26 }
 0x26b   :  { %1364 = vmatprep.subr.bf16.mxu0 %v1363_v29 }
 0x26e   :  { %1366 = vmatpush3.bf16.msra.mxu0 %v1363_v29 }
 0x26f   :  { %1368 = vmatprep.subr.bf16.mxu0 %v1367_v48 }
 0x272   :  { %1370 = vmatpush3.bf16.msra.mxu0 %v1367_v48 }
 0x273   :  { %1372 = vmatprep.subr.bf16.mxu0 %v1371_v51 }
 0x276   :  { %1374 = vmatpush3.bf16.msra.mxu0 %v1371_v51 }
 0x30c   :  { %v1014_v30 = vpop.f32.mrb[0].mxu0 }
 0x30d   :  { %v1015_v31 = vpop.f32.mrb[1].mxu0 }
 0x30e   :  { %v1016_v32 = vadd.f32 %v1015_v31, %v1014_v30 }
 0x310   :  { %v1017_v33 = vpop.f32.mrb[2].mxu0  ;;  %v643_v40 = vadd.f32 %v1016_v32, %v574_v37 }
 0x311   :  { %v1018_v34 = vpop.f32.mrb[3].mxu0 }
 0x312   :  { %v1019_v35 = vadd.f32 %v1018_v34, %v1017_v33 }
 0x314   :  { %v648_v38 = vadd.f32 %v1019_v35, %v575_v36 }
 0x32c   :  { %v1130_v39 = vpop.f32.mrb[4].mxu0 }
 0x32d   :  { %v723_v41 = vadd.f32 %v1130_v39, %v648_v38  ;;  %v717_v42 = vpop.f32.mrb[5].mxu0 }
 0x32e   :  { %v718_v43 = vadd.f32 %v717_v42, %v643_v40 }
 0x32f   :  { %v727_v45 = vadd.f32 %v723_v41, %v1580_v1 }
 0x330   :  { %v726_v44 = vadd.f32 %v718_v43, %v1575_v0 }
 0x332   :  { %1163 = vmatprep.mubr.f32.mxu1 %v726_v44 }
 0x333   :  { %1164 = vmatmul.mubr.f32.vlgmr.msra.gmra.mrb[24].mxu1 %v727_v45 }
 0x406   :  { %v1165_v53 = vpop.f32.mrb[24].mxu1 }
 0x407   :  { %v823_v0 = vadd.f32 %v1165_v53, %v966_v52  ;;  %v817_v54 = vpop.f32.mrb[25].mxu1 }
 0x408   :  { %v818_v1 = vadd.f32 %v966_v52, %v817_v54 }
 0x409   :  { %v829_v55 = vmul.f32 0.1, %v823_v0  ;;  %vm827_vm6 = vcmp.gt.f32.partialorder %v823_v0, 0.0 }
 0x40a   :  { %v828_v56 = vmul.f32 0.1, %v818_v1  ;;  %vm826_vm7 = vcmp.gt.f32.partialorder %v818_v1, 0.0 }
 0x40b   :  { %v831_v58 = vsel %vm827_vm6, %v823_v0, %v829_v55 }
 0x40c   :  { %v830_v57 = vsel %vm826_vm7, %v818_v1, %v828_v56 }
 0x40d   :  { %1198 = vmatprep.mubr.f32.mxu0 %v830_v57 }
 0x40e   :  { %1199 = vmatmul.mubr.f32.vlgmr.msra.gmra.mrb[6].mxu0 %v831_v58 }
 0x4e1   :  { %v1200_v60 = vpop.f32.mrb[6].mxu0 }
 0x4e2   :  { %v927_v15 = vadd.f32 %v1200_v60, %v967_v59  ;;  %v921_v61 = vpop.f32.mrb[7].mxu0 }
 0x4e3   :  { %v922_v62 = vadd.f32 %v967_v59, %v921_v61 }
 0x4e4   :  { %v931_v63 = vadd.f32 %v927_v15, %v727_v45 }
 0x4e5   :  { %v930_v2 = vadd.f32 %v922_v62, %v726_v44 }
 0x4e6   :  { %933 = vst [vmem:[%s1911_s14 + $0x8] sm:$0xff] %v931_v63 }
 0x4e7   :  { %932 = vst [vmem:[%s1911_s14] sm:$0xff] %v930_v2 }
 0x4e8   :  { %938 = vsyncpa [#allocation3], 1 }
 0x4e9   :  { %939 = vsyncpa [#allocation5], 1 }

</bundles_post_ra>
